<compile_context>
chip_gen: v7x
topology: tpu7x:2x2x1
jax: 0.10.0
libtpu: 0.0.40
codegen_flags: <defaults>
</compile_context>

<pallas_src>
import functools

import jax
import jax.numpy as jnp
from jax.experimental import pallas as pl
from jax.experimental.pallas import tpu as pltpu

LANE = 128          # lane width: output/hidden dims padded to multiples of 128
SUBLANE_BF16 = 16   # bf16 sublane granule used for batch-tile rounding


def _round_up(x: int, m: int) -> int:
    return ((x + m - 1) // m) * m


def _make_mlp_kernel(n_layers: int):
    """Fused MLP kernel: (Linear -> ReLU) * (n_layers - 1) -> Linear."""

    def kernel(*refs):
        # refs = [x_ref, w0, b0, w1, b1, ..., w_{n-1}, b_{n-1}, o_ref]
        x_ref = refs[0]
        o_ref = refs[-1]
        # In-kernel f32 -> bf16 cast: VPU work fully hidden under the x DMA.
        h = x_ref[...].astype(jnp.bfloat16)            # (batch_tile, 784)
        for l in range(n_layers):
            w = refs[1 + 2 * l][...]                   # bf16 (in, out_pad)
            bias = refs[2 + 2 * l][...]                # f32  (1, out_pad)
            h = jnp.dot(h, w, preferred_element_type=jnp.float32) + bias
            if l < n_layers - 1:
                # ReLU, then back to bf16 so the next matmul runs at bf16 rate.
                h = jnp.maximum(h, 0.0).astype(w.dtype)
        o_ref[...] = h.astype(o_ref.dtype)             # lane-dense bf16 store

    return kernel


def init_sdr_mlp_params(key, hiddens, num_classes):
    """Deterministic nn.Linear-style init; weights stored as (in, out), f32."""
    dims = list(hiddens) + [num_classes]
    params = []
    for i in range(len(dims) - 1):
        fan_in, fan_out = dims[i], dims[i + 1]
        key, wk, bk = jax.random.split(key, 3)
        bound = 1.0 / (fan_in ** 0.5)
        w = jax.random.uniform(wk, (fan_in, fan_out), jnp.float32, -bound, bound)
        b = jax.random.uniform(bk, (1, fan_out), jnp.float32, -bound, bound)
        params.append((w, b))
    return params


def pad_and_cast_params(params):
    """Zero-pad output/hidden dims to lane multiples (128); weights -> bf16.

    The first layer's input dim (784) is left UNPADDED: the x block uses the
    full feature dim, and 784 % 16 == 0 satisfies the bf16 sublane constraint.
    Zero padding keeps the math exact: padded hidden units compute 0, survive
    ReLU as 0, and the padded rows of the next weight matrix contribute nothing.
    Do this ONCE outside the hot path.
    """
    padded = []
    prev = params[0][0].shape[0]                      # 784, kept unpadded
    for w, b in params:
        fan_in, fan_out = w.shape
        out_p = _round_up(fan_out, LANE)
        w_p = jnp.zeros((prev, out_p), jnp.bfloat16)
        w_p = w_p.at[:fan_in, :fan_out].set(w.astype(jnp.bfloat16))
        b_p = jnp.zeros((1, out_p), jnp.float32).at[:, :fan_out].set(b)
        padded.append((w_p, b_p))
        prev = out_p
    return padded


@functools.partial(jax.jit, static_argnames=("num_classes", "batch_tile"))
def sdr_mlp_forward(x, padded_params, num_classes: int, batch_tile: int = 1024):
    """Forward pass: x.reshape(-1, 784) -> fused MLP Pallas kernel."""
    n_layers = len(padded_params)
    k_in = padded_params[0][0].shape[0]       # 784 (unpadded feature dim)
    c_pad = padded_params[-1][0].shape[1]     # 128 (lane-dense output width)

    # Glue: flatten exactly like the PyTorch forward (x.reshape(-1, 28*28)).
    x2 = x.reshape(-1, 28 * 28)
    b = x2.shape[0]
    assert x2.shape[1] == k_in

    # Tile selection: keep a bf16-sublane-friendly multiple of 16 and clamp for
    # small batches so tiny batches only pay for the rows they have.  (On v7x,
    # pick batch_tile so real workloads get >= 2 grid steps for both TCs.)
    batch_tile = _round_up(batch_tile, SUBLANE_BF16)
    batch_tile = min(batch_tile, _round_up(b, SUBLANE_BF16))
    grid = pl.cdiv(b, batch_tile)  # ragged last block: OOB reads unused, OOB writes dropped

    # Flatten (w, b) pairs into the pallas_call argument list.
    flat_args = [x2]
    in_specs = [pl.BlockSpec((batch_tile, k_in), lambda i: (i, 0))]
    for w, bias in padded_params:
        flat_args.extend([w, bias])
        # Constant index maps -> fetched once, resident across all grid steps.
        in_specs.append(pl.BlockSpec(w.shape, lambda i: (0, 0)))
        in_specs.append(pl.BlockSpec(bias.shape, lambda i: (0, 0)))

    # Advisory cost estimate for XLA's scheduler.
    flops = 2 * b * sum(int(w.shape[0]) * int(w.shape[1]) for w, _ in padded_params)
    bytes_accessed = (b * k_in * 4                                    # x read (f32)
                      + sum(w.size * 2 + bias.size * 4 for w, bias in padded_params)
                      + b * c_pad * 2)                                # out write (bf16)
    cost = pl.CostEstimate(flops=flops, transcendentals=0,
                           bytes_accessed=int(bytes_accessed))

    # VMEM budget: double-buffered x/out tiles + resident (double-buffered)
    # weights + in-kernel temporaries (bf16 x cast, f32 accumulators) + margin.
    in_tile = batch_tile * k_in * 4
    out_tile = batch_tile * c_pad * 2
    w_bytes = sum(w.size * 2 + bias.size * 4 for w, bias in padded_params)
    max_out = max(int(w.shape[1]) for w, _ in padded_params)
    temps = batch_tile * k_in * 2 + 2 * batch_tile * max_out * 4
    vmem_limit = 2 * (in_tile + out_tile + w_bytes) + temps + (8 << 20)
    if vmem_limit > (48 << 20):   # conservative ceiling, safe on v7x (64 MiB physical)
        raise ValueError(
            f"batch_tile={batch_tile} needs ~{vmem_limit >> 20} MiB VMEM; "
            "lower batch_tile.")

    out = pl.pallas_call(
        _make_mlp_kernel(n_layers),
        out_shape=jax.ShapeDtypeStruct((b, c_pad), jnp.bfloat16),
        grid=(grid,),
        in_specs=in_specs,
        out_specs=pl.BlockSpec((batch_tile, c_pad), lambda i: (i, 0)),
        compiler_params=pltpu.CompilerParams(
            dimension_semantics=("parallel",),
            vmem_limit_bytes=int(vmem_limit)),
        cost_estimate=cost,
    )(*flat_args)

    # Drop the lane padding of the classes; return f32 logits like the module.
    return out[:, :num_classes].astype(jnp.float32)


def _reference_forward(x, params):
    """Pure-JAX f32 reference for correctness checking (unpadded params)."""
    h = x.reshape(-1, 28 * 28).astype(jnp.float32)
    n = len(params)
    for l, (w, bias) in enumerate(params):
        h = h @ w + bias
        if l < n - 1:
            h = jnp.maximum(h, 0.0)
    return h


if __name__ == "__main__":
    key = jax.random.PRNGKey(0)

    # Small MNIST-like config: hiddens = [784, 32], num_classes = 10.
    hiddens = [28 * 28, 32]
    num_classes = 10

    k_params, k_x = jax.random.split(key)
    params = init_sdr_mlp_params(k_params, hiddens, num_classes)
    padded_params = pad_and_cast_params(params)        # one-time prep

    # Small NCHW image batch (B, 1, 28, 28); forward flattens it to (B, 784).
    batch = 16
    x = jax.random.normal(k_x, (batch, 1, 28, 28), jnp.float32)

    out = sdr_mlp_forward(x, padded_params, num_classes)
    out = jax.block_until_ready(out)

    ref = _reference_forward(x, params)
    assert out.shape == (batch, num_classes), out.shape
    # bf16 weights/activations/output -> loosened tolerance vs f32 reference.
    assert jnp.allclose(out, ref, atol=5e-2, rtol=5e-2), "mismatch vs reference"

    print("KERNEL_OK")
</pallas_src>

<mosaic_0001>
module attributes {stable_mosaic.version = 11 : i64} {
  func.func @kernel(%arg0: i32, %arg1: memref<16x784xf32, #tpu.memory_space<vmem>>, %arg2: memref<784x128xbf16, #tpu.memory_space<vmem>>, %arg3: memref<1x128xf32, #tpu.memory_space<vmem>>, %arg4: memref<128x128xbf16, #tpu.memory_space<vmem>>, %arg5: memref<1x128xf32, #tpu.memory_space<vmem>>, %arg6: memref<16x128xbf16, #tpu.memory_space<vmem>>) attributes {dimension_semantics = [#tpu.dimension_semantics<parallel>], iteration_bounds = array<i64: 1>, scalar_prefetch = 0 : i64, scratch_operands = 0 : i64, tpu.core_type = #tpu.core_type<tc>, window_params = [{transform_indices = @transform_0, window_bounds = array<i64: 16, 784>}, {pipeline_mode = #tpu.pipeline_mode<synchronous>, transform_indices = @transform_1, window_bounds = array<i64: 784, 128>}, {pipeline_mode = #tpu.pipeline_mode<synchronous>, transform_indices = @transform_2, window_bounds = array<i64: 1, 128>}, {pipeline_mode = #tpu.pipeline_mode<synchronous>, transform_indices = @transform_3, window_bounds = array<i64: 128, 128>}, {pipeline_mode = #tpu.pipeline_mode<synchronous>, transform_indices = @transform_4, window_bounds = array<i64: 1, 128>}, {transform_indices = @transform_5, window_bounds = array<i64: 16, 128>}]} {
    %c0 = arith.constant 0 : index
    %c0_0 = arith.constant 0 : index
    %0 = vector.load %arg1[%c0, %c0_0] : memref<16x784xf32, #tpu.memory_space<vmem>>, vector<16x784xf32>
    %1 = arith.truncf %0 : vector<16x784xf32> to vector<16x784xbf16>
    %c0_1 = arith.constant 0 : index
    %c0_2 = arith.constant 0 : index
    %2 = vector.load %arg2[%c0_1, %c0_2] : memref<784x128xbf16, #tpu.memory_space<vmem>>, vector<784x128xbf16>
    %c0_3 = arith.constant 0 : index
    %c0_4 = arith.constant 0 : index
    %3 = vector.load %arg3[%c0_3, %c0_4] : memref<1x128xf32, #tpu.memory_space<vmem>>, vector<1x128xf32>
    %cst = arith.constant dense<0.000000e+00> : vector<16x128xf32>
    %4 = tpu.matmul %1, %2, %cst {dimension_numbers = #tpu.dot_dimension_numbers<[1], [0], [0], [1], [0, 0, 1, 1], [], []>} : vector<16x784xbf16>, vector<784x128xbf16>, vector<16x128xf32> -> vector<16x128xf32>
    %5 = vector.broadcast %3 : vector<1x128xf32> to vector<16x128xf32>
    %6 = arith.addf %4, %5 : vector<16x128xf32>
    %cst_5 = arith.constant 0.000000e+00 : f32
    %7 = vector.broadcast %cst_5 : f32 to vector<16x128xf32>
    %8 = arith.maximumf %6, %7 : vector<16x128xf32>
    %9 = arith.truncf %8 : vector<16x128xf32> to vector<16x128xbf16>
    %c0_6 = arith.constant 0 : index
    %c0_7 = arith.constant 0 : index
    %10 = vector.load %arg4[%c0_6, %c0_7] : memref<128x128xbf16, #tpu.memory_space<vmem>>, vector<128x128xbf16>
    %c0_8 = arith.constant 0 : index
    %c0_9 = arith.constant 0 : index
    %11 = vector.load %arg5[%c0_8, %c0_9] : memref<1x128xf32, #tpu.memory_space<vmem>>, vector<1x128xf32>
    %cst_10 = arith.constant dense<0.000000e+00> : vector<16x128xf32>
    %12 = tpu.matmul %9, %10, %cst_10 {dimension_numbers = #tpu.dot_dimension_numbers<[1], [0], [0], [1], [0, 0, 1, 1], [], []>} : vector<16x128xbf16>, vector<128x128xbf16>, vector<16x128xf32> -> vector<16x128xf32>
    %13 = vector.broadcast %11 : vector<1x128xf32> to vector<16x128xf32>
    %14 = arith.addf %12, %13 : vector<16x128xf32>
    %15 = arith.truncf %14 : vector<16x128xf32> to vector<16x128xbf16>
    %c0_11 = arith.constant 0 : index
    %c0_12 = arith.constant 0 : index
    %16 = vector.load %arg6[%c0_11, %c0_12] : memref<16x128xbf16, #tpu.memory_space<vmem>>, vector<16x128xbf16>
    tpu.vector_store %arg6[%c0_11, %c0_12], %15 {strides = array<i32>} : memref<16x128xbf16, #tpu.memory_space<vmem>>, vector<16x128xbf16>,
    return
  }
  func.func @transform_0(%arg0: i32) -> (i32, i32) {
    %c0_i32 = arith.constant 0 : i32
    %c0_i32_0 = arith.constant 0 : i32
    return %arg0, %c0_i32 : i32, i32
  }
  func.func @transform_1(%arg0: i32) -> (i32, i32) {
    %c0_i32 = arith.constant 0 : i32
    %c0_i32_0 = arith.constant 0 : i32
    %c0_i32_1 = arith.constant 0 : i32
    return %c0_i32, %c0_i32_0 : i32, i32
  }
  func.func @transform_2(%arg0: i32) -> (i32, i32) {
    %c0_i32 = arith.constant 0 : i32
    %c0_i32_0 = arith.constant 0 : i32
    %c0_i32_1 = arith.constant 0 : i32
    return %c0_i32, %c0_i32_0 : i32, i32
  }
  func.func @transform_3(%arg0: i32) -> (i32, i32) {
    %c0_i32 = arith.constant 0 : i32
    %c0_i32_0 = arith.constant 0 : i32
    %c0_i32_1 = arith.constant 0 : i32
    return %c0_i32, %c0_i32_0 : i32, i32
  }
  func.func @transform_4(%arg0: i32) -> (i32, i32) {
    %c0_i32 = arith.constant 0 : i32
    %c0_i32_0 = arith.constant 0 : i32
    %c0_i32_1 = arith.constant 0 : i32
    return %c0_i32, %c0_i32_0 : i32, i32
  }
  func.func @transform_5(%arg0: i32) -> (i32, i32) {
    %c0_i32 = arith.constant 0 : i32
    %c0_i32_0 = arith.constant 0 : i32
    return %arg0, %c0_i32 : i32, i32
  }
}

</mosaic_0001>

<bundles_post_ra>
// kernel: sdr_mlp_forward.1
= control target key start
LH: loop header
LB: loop body
LE: loop exit
PB: predicated region body
PF: predicated region fallthrough
CT: control target
= control target key end

     0   :  { %v969_v43 = vmov 0.0   ;;  %vm970_vm0 = vmmov 0   ;;  %vm441_vm1 = vcmask 130048   ;;  %s1236_s1 = inlined_call_operand.vmem [shape: bf16[784,128], index: 1, kind: input, shape index: {}]   ;;  %s1237_s0 = inlined_call_operand.vmem [shape: f32[16,784], index: 0, kind: input, shape index: {}]   ;;  %s1238_s3 = inlined_call_operand.vmem [shape: bf16[128,128], index: 3, kind: input, shape index: {}]   ;;  %s1239_s2 = inlined_call_operand.vmem [shape: f32[1,128], index: 2, kind: input, shape index: {}]   ;;  %s1240_s4 = inlined_call_operand.vmem [shape: f32[1,128], index: 4, kind: input, shape index: {}]   ;;  %s1241_s5 = inlined_call_operand.vmem [shape: bf16[16,128], index: 5, kind: output, shape index: {}]  }
   0x1   :  { %v912_v0 = vld [vmem:[%s1236_s1 + $0x40] sm:$0xff]   ;;  %v916_v4 = vld [vmem:[%s1236_s1 + $0x48] sm:$0xff]   ;;  %v920_v8 = vld [vmem:[%s1236_s1 + $0x50] sm:$0xff]  }
   0x2   :  { %v913_v1 = vld [vmem:[%s1236_s1] sm:$0xff]   ;;  %807 = vmatprep.subr.bf16.mxu0 %v912_v0  ;;  %v917_v5 = vld [vmem:[%s1236_s1 + $0x8] sm:$0xff]   ;;  %v921_v9 = vld [vmem:[%s1236_s1 + $0x10] sm:$0xff]  }
   0x3   :  { %v914_v2 = vld [vmem:[%s1236_s1 + $0xc0] sm:$0xff]   ;;  %808 = vmatpush3.bf16.msra.mxu0 %v913_v1  ;;  %v918_v6 = vld [vmem:[%s1236_s1 + $0xc8] sm:$0xff]   ;;  %v922_v10 = vld [vmem:[%s1236_s1 + $0xd0] sm:$0xff]  }
   0x4   :  { %v915_v3 = vld [vmem:[%s1236_s1 + $0x80] sm:$0xff]   ;;  %829 = vmatprep.subr.bf16.mxu1 %v914_v2  ;;  %809 = vmatprep.subr.bf16.mxu0 %v916_v4  ;;  %v919_v7 = vld [vmem:[%s1236_s1 + $0x88] sm:$0xff]   ;;  %v923_v11 = vld [vmem:[%s1236_s1 + $0x90] sm:$0xff]  }
   0x5   :  { %830 = vmatpush3.bf16.msra.mxu1 %v915_v3  ;;  %v924_v12 = vld [vmem:[%s1236_s1 + $0x58] sm:$0xff]   ;;  %v928_v16 = vld [vmem:[%s1236_s1 + $0x60] sm:$0xff]   ;;  %v932_v20 = vld [vmem:[%s1236_s1 + $0x68] sm:$0xff]  }
   0x6   :  { %831 = vmatprep.subr.bf16.mxu1 %v918_v6  ;;  %v925_v13 = vld [vmem:[%s1236_s1 + $0x18] sm:$0xff]   ;;  %v929_v17 = vld [vmem:[%s1236_s1 + $0x20] sm:$0xff]   ;;  %v933_v21 = vld [vmem:[%s1236_s1 + $0x28] sm:$0xff]  }
   0x7   :  { %810 = vmatpush3.bf16.msra.mxu0 %v917_v5  ;;  %v926_v14 = vld [vmem:[%s1236_s1 + $0xd8] sm:$0xff]   ;;  %v930_v18 = vld [vmem:[%s1236_s1 + $0xe0] sm:$0xff]   ;;  %v934_v22 = vld [vmem:[%s1236_s1 + $0xe8] sm:$0xff]  }
   0x8   :  { %811 = vmatprep.subr.bf16.mxu0 %v920_v8  ;;  %v927_v15 = vld [vmem:[%s1236_s1 + $0x98] sm:$0xff]   ;;  %v931_v19 = vld [vmem:[%s1236_s1 + $0xa0] sm:$0xff]   ;;  %v935_v23 = vld [vmem:[%s1236_s1 + $0xa8] sm:$0xff]  }
   0x9   :  { %832 = vmatpush3.bf16.msra.mxu1 %v919_v7  ;;  %v936_v24 = vld [vmem:[%s1236_s1 + $0x70] sm:$0xff]   ;;  %v940_v28 = vld [vmem:[%s1236_s1 + $0x78] sm:$0xff]   ;;  %v22_v31 = vld [vmem:[%s1237_s0 + $0x8] sm:$0xff] }
   0xa   :  { %833 = vmatprep.subr.bf16.mxu1 %v922_v10  ;;  %v937_v25 = vld [vmem:[%s1236_s1 + $0x30] sm:$0xff]   ;;  %v941_v29 = vld [vmem:[%s1236_s1 + $0x38] sm:$0xff]   ;;  %v29_v32 = vld [vmem:[%s1237_s0 + $0x40] sm:$0xff] }
   0xb   :  { %812 = vmatpush3.bf16.msra.mxu0 %v921_v9  ;;  %v938_v26 = vld [vmem:[%s1236_s1 + $0xf0] sm:$0xff]   ;;  %v942_v30 = vld [vmem:[%s1236_s1 + $0xf8] sm:$0xff]   ;;  %v36_v33 = vpack.c.bf16 %v29_v32, %v22_v31  ;;  %v21_v35 = vld [vmem:[%s1237_s0] sm:$0xff] }
   0xc   :  { %813 = vmatprep.subr.bf16.mxu0 %v924_v12  ;;  %v939_v27 = vld [vmem:[%s1236_s1 + $0xb0] sm:$0xff]   ;;  %v943_v34 = vld [vmem:[%s1236_s1 + $0xb8] sm:$0xff]   ;;  %v944_v38 = vld [vmem:[%s1236_s1 + $0x140] sm:$0xff]  }
   0xd   :  { %834 = vmatpush3.bf16.msra.mxu1 %v923_v11  ;;  %v28_v36 = vld [vmem:[%s1237_s0 + $0x38] sm:$0xff]  ;;  %477 = vmatprep.mubr.bf16.mxu0 %v36_v33  ;;  %v31_v40 = vld [vmem:[%s1237_s0 + $0x50] sm:$0xff]  ;;  %v945_v42 = vld [vmem:[%s1236_s1 + $0x100] sm:$0xff]  }
   0xe   :  { %835 = vmatprep.subr.bf16.mxu1 %v926_v14  ;;  %v35_v37 = vpack.c.bf16 %v28_v36, %v21_v35  ;;  %v24_v39 = vld [vmem:[%s1237_s0 + $0x18] sm:$0xff]  ;;  %v23_v44 = vld [vmem:[%s1237_s0 + $0x10] sm:$0xff]  ;;  %v30_v45 = vld [vmem:[%s1237_s0 + $0x48] sm:$0xff] }
   0xf   :  { %814 = vmatpush3.bf16.msra.mxu0 %v925_v13  ;;  %v38_v41 = vpack.c.bf16 %v31_v40, %v24_v39  ;;  %v37_v46 = vpack.c.bf16 %v30_v45, %v23_v44  ;;  %v946_v47 = vld [vmem:[%s1236_s1 + $0x148] sm:$0xff]   ;;  %v948_v49 = vld [vmem:[%s1236_s1 + $0x150] sm:$0xff]   ;;  %v950_v51 = vld [vmem:[%s1236_s1 + $0x158] sm:$0xff]  }
  0x10   :  { %815 = vmatprep.subr.bf16.mxu0 %v928_v16  ;;  %v947_v48 = vld [vmem:[%s1236_s1 + $0x108] sm:$0xff]   ;;  %v949_v50 = vld [vmem:[%s1236_s1 + $0x110] sm:$0xff]   ;;  %v951_v52 = vld [vmem:[%s1236_s1 + $0x118] sm:$0xff]  }
  0x11   :  { %836 = vmatpush3.bf16.msra.mxu1 %v927_v15  ;;  %518 = vmatprep.mubr.bf16.mxu1 %v38_v41  ;;  %v952_v53 = vld [vmem:[%s1236_s1 + $0x160] sm:$0xff]   ;;  %v954_v55 = vld [vmem:[%s1236_s1 + $0x168] sm:$0xff]   ;;  %v27_v61 = vld [vmem:[%s1237_s0 + $0x30] sm:$0xff] }
  0x12   :  { %837 = vmatprep.subr.bf16.mxu1 %v930_v18  ;;  %v953_v54 = vld [vmem:[%s1236_s1 + $0x120] sm:$0xff]   ;;  %v26_v57 = vld [vmem:[%s1237_s0 + $0x28] sm:$0xff]  ;;  %v956_v63 = vld [vmem:[%s1236_s1 + $0x170] sm:$0xff]  }
  0x13   :  { %816 = vmatpush3.bf16.msra.mxu0 %v929_v17  ;;  %v960_v56 = vld [vmem:[%s1236_s1 + $0x180] sm:$0xff]   ;;  %v955_v59 = vld [vmem:[%s1236_s1 + $0x128] sm:$0xff]   ;;  %v957_v1 = vld [vmem:[%s1236_s1 + $0x130] sm:$0xff]  }
  0x14   :  { %817 = vmatprep.subr.bf16.mxu0 %v932_v20  ;;  %v33_v58 = vld [vmem:[%s1237_s0 + $0x60] sm:$0xff]  ;;  %v34_v62 = vld [vmem:[%s1237_s0 + $0x68] sm:$0xff]  ;;  %v958_v2 = vld [vmem:[%s1236_s1 + $0x178] sm:$0xff]  }
  0x15   :  { %838 = vmatpush3.bf16.msra.mxu1 %v931_v19  ;;  %v40_v60 = vpack.c.bf16 %v33_v58, %v26_v57  ;;  %v41_v0 = vpack.c.bf16 %v34_v62, %v27_v61  ;;  %v959_v3 = vld [vmem:[%s1236_s1 + $0x138] sm:$0xff]   ;;  %v25_v4 = vld [vmem:[%s1237_s0 + $0x20] sm:$0xff]  ;;  %v962_v8 = vld [vmem:[%s1238_s3 + $0x8] sm:$0xff]  }
  0x16   :  { %839 = vmatprep.subr.bf16.mxu1 %v934_v22  ;;  %v32_v5 = vld [vmem:[%s1237_s0 + $0x58] sm:$0xff]  ;;  %v961_v7 = vld [vmem:[%s1238_s3] sm:$0xff]   ;;  %v963_v9 = vld [vmem:[%s1238_s3 + $0x10] sm:$0xff]  }
  0x17   :  { %818 = vmatpush3.bf16.msra.mxu0 %v933_v21  ;;  %v39_v6 = vpack.c.bf16 %v32_v5, %v25_v4  ;;  %v964_v10 = vld [vmem:[%s1238_s3 + $0x18] sm:$0xff]   ;;  %v965_v11 = vld [vmem:[%s1238_s3 + $0x20] sm:$0xff]   ;;  %v966_v12 = vld [vmem:[%s1238_s3 + $0x28] sm:$0xff]  }
  0x18   :  { %819 = vmatprep.subr.bf16.mxu0 %v936_v24  ;;  %v967_v13 = vld [vmem:[%s1238_s3 + $0x30] sm:$0xff]   ;;  %v968_v14 = vld [vmem:[%s1238_s3 + $0x38] sm:$0xff]   ;;  %v738_v16 = vld [vmem:[%s1239_s2] ss:$0 sm:$0xff] }
  0x19   :  { %840 = vmatpush3.bf16.msra.mxu1 %v935_v23 }
  0x1a   :  { %841 = vmatprep.subr.bf16.mxu1 %v938_v26 }
  0x1b   :  { %820 = vmatpush3.bf16.msra.mxu0 %v937_v25 }
  0x1c   :  { %821 = vmatprep.subr.bf16.mxu0 %v940_v28 }
  0x1d   :  { %842 = vmatpush3.bf16.msra.mxu1 %v939_v27 }
  0x1e   :  { %843 = vmatprep.subr.bf16.mxu1 %v942_v30 }
  0x1f   :  { %822 = vmatpush3.bf16.msra.mxu0 %v941_v29 }
  0x20   :  { %851 = vmatprep.subr.bf16.mxu0 %v944_v38 }
  0x21   :  { %844 = vmatpush3.bf16.msra.mxu1 %v943_v34 }
  0x22   :  { %884 = vmatprep.subr.bf16.mxu1 %v969_v43  ;;  %478 = vmatmul.mubr.bf16.vlgmr.msra.gmra.mrb[0].mxu0 %v35_v37 }
  0x23   :  { %852 = vmatpush3.bf16.msra.mxu0 %v945_v42  ;;  %559 = vmatprep.mubr.bf16.mxu0 %v40_v60 }
  0x24   :  { %519 = vmatmul.mubr.bf16.vlgmr.msra.gmra.mrb[0].mxu1 %v37_v46  ;;  %853 = vmatprep.subr.bf16.mxu0 %v946_v47 }
  0x25   :  { %886 = vmatprep.mubr.msk.bf16.mxu1 %vm970_vm0, %v969_v43  ;;  %885 = vmatpush3.bf16.msra.mxu1 %v960_v56 }
  0x26   :  { %890 = vmatprep.subr.bf16.mxu1 %v969_v43 }
  0x27   :  { %854 = vmatpush3.bf16.msra.mxu0 %v947_v48 }
  0x28   :  { %855 = vmatprep.subr.bf16.mxu0 %v948_v49  ;;  %v789_v49 = vld [vmem:[%s1240_s4] ss:$0 sm:$0xff] }
  0x2b   :  { %856 = vmatpush3.bf16.msra.mxu0 %v949_v50 }
  0x2c   :  { %857 = vmatprep.subr.bf16.mxu0 %v950_v51  ;;  %887 = vmatmul.mubr.msk.bf16.vlgmr.msra.gmra.mrb[4].mxu1 %vm441_vm1, %v41_v0 }
  0x2d   :  { %906 = vmatprep.mubr.msk.bf16.mxu1 %vm970_vm0, %v969_v43  ;;  %891 = vmatpush3.bf16.msra.mxu1 %v961_v7 }
  0x2e   :  { %892 = vmatprep.subr.bf16.mxu1 %v969_v43 }
  0x2f   :  { %858 = vmatpush3.bf16.msra.mxu0 %v951_v52 }
  0x30   :  { %859 = vmatprep.subr.bf16.mxu0 %v952_v53 }
  0x31   :  { %893 = vmatpush3.bf16.msra.mxu1 %v962_v8 }
  0x32   :  { %894 = vmatprep.subr.bf16.mxu1 %v969_v43 }
  0x33   :  { %860 = vmatpush3.bf16.msra.mxu0 %v953_v54 }
  0x34   :  { %861 = vmatprep.subr.bf16.mxu0 %v954_v55 }
  0x35   :  { %895 = vmatpush3.bf16.msra.mxu1 %v963_v9 }
  0x36   :  { %896 = vmatprep.subr.bf16.mxu1 %v969_v43 }
  0x37   :  { %862 = vmatpush3.bf16.msra.mxu0 %v955_v59 }
  0x38   :  { %863 = vmatprep.subr.bf16.mxu0 %v956_v63 }
  0x39   :  { %897 = vmatpush3.bf16.msra.mxu1 %v964_v10 }
  0x3a   :  { %898 = vmatprep.subr.bf16.mxu1 %v969_v43 }
  0x3b   :  { %864 = vmatpush3.bf16.msra.mxu0 %v957_v1 }
  0x3c   :  { %865 = vmatprep.subr.bf16.mxu0 %v958_v2 }
  0x3d   :  { %899 = vmatpush3.bf16.msra.mxu1 %v965_v11 }
  0x3e   :  { %900 = vmatprep.subr.bf16.mxu1 %v969_v43 }
  0x3f   :  { %866 = vmatpush3.bf16.msra.mxu0 %v959_v3 }
  0x41   :  { %901 = vmatpush3.bf16.msra.mxu1 %v966_v12 }
  0x42   :  { %560 = vmatmul.mubr.bf16.vlgmr.msra.gmra.mrb[4].mxu0 %v39_v6  ;;  %902 = vmatprep.subr.bf16.mxu1 %v969_v43 }
  0x45   :  { %903 = vmatpush3.bf16.msra.mxu1 %v967_v13 }
  0x46   :  { %904 = vmatprep.subr.bf16.mxu1 %v969_v43 }
  0x49   :  { %905 = vmatpush3.bf16.msra.mxu1 %v968_v14 }
  0xf5   :  { %v823_v15 = vpop.f32.mrb[0].mxu0 }
  0xf6   :  { %v824_v17 = vpop.f32.mrb[1].mxu0 }
  0xf7   :  { %v825_v18 = vadd.f32 %v824_v17, %v823_v15  ;;  %v826_v19 = vpop.f32.mrb[2].mxu0  ;;  %v845_v20 = vpop.f32.mrb[0].mxu1 }
  0xf8   :  { %v827_v21 = vpop.f32.mrb[3].mxu0  ;;  %v846_v24 = vpop.f32.mrb[1].mxu1 }
  0xf9   :  { %v480_v22 = vadd.f32 %v825_v18, %v738_v16  ;;  %v828_v23 = vadd.f32 %v827_v21, %v826_v19  ;;  %v847_v25 = vadd.f32 %v846_v24, %v845_v20  ;;  %v848_v26 = vpop.f32.mrb[2].mxu1 }
  0xfa   :  { %v849_v28 = vpop.f32.mrb[3].mxu1 }
  0xfb   :  { %v483_v27 = vadd.f32 %v828_v23, %v738_v16  ;;  %v521_v29 = vadd.f32 %v847_v25, %v480_v22  ;;  %v850_v30 = vadd.f32 %v849_v28, %v848_v26 }
  0xfd   :  { %v524_v31 = vadd.f32 %v850_v30, %v483_v27 }
  0xff   :  { %v602_v32 = vpop.f32.mrb[4].mxu1 }
 0x100   :  { %v888_v33 = vpop.f32.mrb[5].mxu1 }
 0x101   :  { %v605_v34 = vpop.f32.mrb[6].mxu1 }
 0x102   :  { %v889_v35 = vpop.f32.mrb[7].mxu1 }
 0x115   :  { %v867_v36 = vpop.f32.mrb[4].mxu0 }
 0x116   :  { %v868_v37 = vpop.f32.mrb[5].mxu0 }
 0x117   :  { %v869_v38 = vadd.f32 %v868_v37, %v867_v36  ;;  %v870_v39 = vpop.f32.mrb[6].mxu0 }
 0x118   :  { %v871_v40 = vpop.f32.mrb[7].mxu0 }
 0x119   :  { %v562_v41 = vadd.f32 %v869_v38, %v521_v29  ;;  %v872_v42 = vadd.f32 %v871_v40, %v870_v39 }
 0x11b   :  { %v603_v43 = vadd.f32 %v602_v32, %v562_v41  ;;  %v565_v44 = vadd.f32 %v872_v42, %v524_v31 }
 0x11d   :  { %v606_v45 = vadd.f32 %v605_v34, %v565_v44  ;;  %v609_v46 = vmax.f32 %v603_v43, 0.0 }
 0x11f   :  { %v610_v47 = vmax.f32 %v606_v45, 0.0 }
 0x121   :  { %v611_v48 = vpack.c.bf16 %v610_v47, %v609_v46 }
 0x123   :  { %907 = vmatmul.mubr.bf16.vlgmr.msra.gmra.mrb[8].mxu1 %v611_v48 }
 0x1f6   :  { %v717_v50 = vpop.f32.mrb[8].mxu1 }
 0x1f7   :  { %v908_v51 = vpop.f32.mrb[9].mxu1  ;;  %v718_v53 = vadd.f32 %v789_v49, %v717_v50 }
 0x1f8   :  { %v720_v52 = vpop.f32.mrb[10].mxu1 }
 0x1f9   :  { %v721_v54 = vadd.f32 %v789_v49, %v720_v52  ;;  %v909_v55 = vpop.f32.mrb[11].mxu1 }
 0x1fb   :  { %v805_v56 = vpack.c.bf16 %v721_v54, %v718_v53 }
 0x1fd   :  { %806 = vst [vmem:[%s1241_s5] sm:$0xff] %v805_v56  }

</bundles_post_ra>
